<compile_context>
chip_gen: v5e
topology: v5e:2x2
jax: 0.10.0
libtpu: 0.0.40
codegen_flags: <defaults>
</compile_context>

<pallas_src>
import math

import jax
import jax.numpy as jnp
from jax.experimental import pallas as pl
from jax.experimental.pallas import tpu as pltpu


# ---------------------------------------------------------------------------
# Buffer construction — deterministic, mirrors PyTorch __init__ (f32 table).
# ---------------------------------------------------------------------------
def make_pe(d_model: int, max_len: int = 5000) -> jnp.ndarray:
    position = jnp.arange(max_len, dtype=jnp.float32)[:, None]          # [L, 1]
    div_term = jnp.exp(
        jnp.arange(0, d_model, 2, dtype=jnp.float32)
        * (-math.log(10000.0) / d_model)
    )                                                                    # [D/2]
    pe = jnp.zeros((1, max_len, d_model), dtype=jnp.float32)
    pe = pe.at[0, :, 0::2].set(jnp.sin(position * div_term))
    pe = pe.at[0, :, 1::2].set(jnp.cos(position * div_term))
    return pe


def _round_up(x: int, m: int) -> int:
    return (x + m - 1) // m * m


def _vmem_capacity_bytes() -> int:
    try:
        return int(pltpu.get_tpu_info().vmem_capacity_bytes)
    except Exception:
        return 64 << 20      # conservative (v7x-sized) fallback, safe everywhere


def _budgets():
    """(per-step block budget, vmem_limit clamp) — generation aware."""
    cap = _vmem_capacity_bytes()
    budget = (16 << 20) if cap >= (96 << 20) else (8 << 20)   # v5e/v6e vs v7x
    cap_limit = min((cap * 3) // 4, 100 << 20)                # 96 MiB / 48 MiB
    return budget, cap_limit


# ---------------------------------------------------------------------------
# PE slab: pack the (consecutive) per-tensor PE slices into one f32 row,
# each chunk starting at a 128-lane-aligned offset.
# ---------------------------------------------------------------------------
def _build_pe_slab(pe: jnp.ndarray, seq_lens, d_model: int):
    chunks, offs = [], []
    src = 0
    dst = 0
    for s in seq_lens:
        L = s * d_model
        Lp = _round_up(L, 128)
        chunk = pe[0, src:src + s, :].reshape(1, L).astype(jnp.float32)
        if Lp > L:
            chunk = jnp.pad(chunk, ((0, 0), (0, Lp - L)))
        chunks.append(chunk)
        offs.append(dst)
        src += s
        dst += Lp
    slab = jnp.concatenate(chunks, axis=1) if len(chunks) > 1 else chunks[0]
    return slab, tuple(offs)


# ---------------------------------------------------------------------------
# Fused kernel: for each tensor i, out_i = cast(x_i.f32 + pe_slab[:, off_i:+L_i])
# Refs arrive as (x_0..x_{n-1}, pe_slab, out_0..out_{n-1}).
# ---------------------------------------------------------------------------
def _make_fused_kernel(lane_lens, slab_offs):
    n = len(lane_lens)

    def kernel(*refs):
        x_refs = refs[:n]
        pe_ref = refs[n]
        o_refs = refs[n + 1:]
        for idx in range(n):
            L = lane_lens[idx]
            off = slab_offs[idx]
            pe_blk = pe_ref[:, off:off + L]                   # (1, L) f32, aligned start
            x = x_refs[idx][...]
            o_refs[idx][...] = (x.astype(jnp.float32) + pe_blk).astype(o_refs[idx].dtype)

    return kernel


# ---------------------------------------------------------------------------
# Fallback for huge rows: per-tensor 2-D (batch x lane) tiled add.
# ---------------------------------------------------------------------------
def _lane_tiled_kernel(x_ref, pe_ref, o_ref):
    o_ref[...] = (x_ref[...].astype(jnp.float32) + pe_ref[...]).astype(o_ref.dtype)


def _lane_tiled_add_pe(x2d, pe2d_f32, budget, cap_limit):
    B, L = x2d.shape
    isz = jnp.dtype(x2d.dtype).itemsize
    bt = B if B <= 8 else 8
    lt = max(128, (budget // max(1, bt * isz)) // 128 * 128)
    if lt >= L:
        lt = L                                                 # full extent is always legal
    grid = (pl.cdiv(B, bt), pl.cdiv(L, lt))
    vmem_est = 4 * bt * lt * isz + 2 * lt * 4 + (1 << 20)
    vmem_limit = int(min(max(vmem_est, 16 << 20), cap_limit))
    return pl.pallas_call(
        _lane_tiled_kernel,
        out_shape=jax.ShapeDtypeStruct((B, L), x2d.dtype),
        grid_spec=pltpu.PrefetchScalarGridSpec(
            num_scalar_prefetch=0,
            grid=grid,
            in_specs=[pl.BlockSpec((bt, lt), lambda i, j: (i, j)),
                      pl.BlockSpec((1, lt), lambda i, j: (0, j))],
            out_specs=pl.BlockSpec((bt, lt), lambda i, j: (i, j)),
        ),
        compiler_params=pltpu.CompilerParams(
            dimension_semantics=("parallel", "parallel"),
            vmem_limit_bytes=vmem_limit,
        ),
        cost_estimate=pl.CostEstimate(
            flops=B * L, transcendentals=0,
            bytes_accessed=2 * B * L * isz + L * 4),
    )(x2d, pe2d_f32)


# ---------------------------------------------------------------------------
# Wrapper: one fused pallas_call for all tensors (goal / slots / observations).
# ---------------------------------------------------------------------------
def fused_add_pe(xs, pe_slab, slab_offs):
    """xs: list of [B, S_i, D]; pe_slab: [1, slab_len] f32 (aligned-packed PE)."""
    B = xs[0].shape[0]
    D = xs[0].shape[2]
    seq_lens = [int(x.shape[1]) for x in xs]
    lane_lens = [s * D for s in seq_lens]
    itemsizes = [jnp.dtype(x.dtype).itemsize for x in xs]
    row_bytes = sum(L * i for L, i in zip(lane_lens, itemsizes))   # one batch row, all tensors
    pe_bytes = int(pe_slab.shape[1]) * 4

    budget, cap_limit = _budgets()
    xs2d = [x.reshape(B, L) for x, L in zip(xs, lane_lens)]

    def footprint(bt):
        # double-buffered in + out blocks, double-buffered PE slab, 1 MiB slack
        return 4 * bt * row_bytes + 2 * pe_bytes + (1 << 20)

    # ---- batch-tile selection: few fat steps, but never a 1-step grid on big B
    if B <= 8:
        bt = B
    else:
        bt = min(B, max(8, (budget // max(1, row_bytes)) // 8 * 8))
        if bt >= B:
            # keep >= 2 grid steps so the "parallel" axis engages both v7x TCs
            bt = max(8, _round_up((B + 1) // 2, 8))
        while bt > 8 and footprint(bt) > cap_limit:
            bt -= 8

    if footprint(bt) > cap_limit:
        # Even the smallest legal batch tile overflows VMEM (huge S*D):
        # fall back to per-tensor lane-tiled kernels (128-multiple lane blocks).
        outs2d = []
        for x2d, L, off in zip(xs2d, lane_lens, slab_offs):
            pe_i = pe_slab[:, off:off + L]
            outs2d.append(_lane_tiled_add_pe(x2d, pe_i, budget, cap_limit))
        return [o.reshape(B, s, D) for o, s in zip(outs2d, seq_lens)]

    grid = (pl.cdiv(B, bt),)
    vmem_limit = int(min(max(footprint(bt), 16 << 20), cap_limit))

    in_specs = (
        [pl.BlockSpec((bt, L), lambda i: (i, 0)) for L in lane_lens]      # x blocks
        + [pl.BlockSpec((1, int(pe_slab.shape[1])), lambda i: (0, 0))]    # PE slab (broadcast)
    )
    out_specs = tuple(pl.BlockSpec((bt, L), lambda i: (i, 0)) for L in lane_lens)
    out_shape = tuple(jax.ShapeDtypeStruct((B, L), x.dtype)
                      for x, L in zip(xs, lane_lens))

    kernel = _make_fused_kernel(tuple(lane_lens), tuple(slab_offs))
    outs = pl.pallas_call(
        kernel,
        out_shape=out_shape,
        grid_spec=pltpu.PrefetchScalarGridSpec(
            num_scalar_prefetch=0,
            grid=grid,
            in_specs=in_specs,
            out_specs=out_specs,
        ),
        compiler_params=pltpu.CompilerParams(
            dimension_semantics=("parallel",),        # v7x: shard batch tiles over 2 TCs
            vmem_limit_bytes=vmem_limit,
        ),
        cost_estimate=pl.CostEstimate(
            flops=B * sum(lane_lens),
            transcendentals=0,
            bytes_accessed=2 * B * row_bytes + pe_bytes),
    )(*xs2d, pe_slab)

    return [o.reshape(B, s, D) for o, s in zip(outs, seq_lens)]


# ---------------------------------------------------------------------------
# SlotMAEPE forward (matches the PyTorch module's semantics / return order).
# ---------------------------------------------------------------------------
class SlotMAEPE:
    def __init__(self, d_model: int, max_len: int = 5000):
        self.d_model = d_model
        self.max_len = max_len
        self.pe = make_pe(d_model, max_len)   # [1, max_len, d_model] f32
        self._slab_cache = {}

    def _pe_slab(self, seq_lens):
        key = tuple(int(s) for s in seq_lens)
        if key not in self._slab_cache:
            self._slab_cache[key] = _build_pe_slab(self.pe, key, self.d_model)
        return self._slab_cache[key]

    def __call__(self, slots, observations, goal=None):
        if goal is not None:
            seq_lens = (goal.shape[1], slots.shape[1], observations.shape[1])
            slab, offs = self._pe_slab(seq_lens)
            goal_o, slots_o, obs_o = fused_add_pe([goal, slots, observations], slab, offs)
            return slots_o, goal_o, obs_o
        else:
            seq_lens = (slots.shape[1], observations.shape[1])
            slab, offs = self._pe_slab(seq_lens)
            slots_o, obs_o = fused_add_pe([slots, observations], slab, offs)
            return slots_o, obs_o


# ---------------------------------------------------------------------------
# Self-check
# ---------------------------------------------------------------------------
if __name__ == "__main__":
    B, D = 2, 32
    slot_len, obs_len, goal_len = 8, 8, 4
    max_len = 64

    key = jax.random.PRNGKey(0)
    k1, k2, k3, k4 = jax.random.split(key, 4)
    slots = jax.random.normal(k1, (B, slot_len, D), dtype=jnp.float32)
    observations = jax.random.normal(k2, (B, obs_len, D), dtype=jnp.float32)
    goal = jax.random.normal(k3, (B, goal_len, D), dtype=jnp.float32)

    module = SlotMAEPE(d_model=D, max_len=max_len)
    pe = module.pe

    # --- case 1: with goal ---
    s_out, g_out, o_out = module(slots, observations, goal)
    jax.block_until_ready((s_out, g_out, o_out))
    g_ref = goal + pe[:, :goal_len]
    s_ref = slots + pe[:, goal_len:goal_len + slot_len]
    o_ref = observations + pe[:, goal_len + slot_len:goal_len + slot_len + obs_len]
    assert jnp.allclose(g_out, g_ref, atol=1e-6)
    assert jnp.allclose(s_out, s_ref, atol=1e-6)
    assert jnp.allclose(o_out, o_ref, atol=1e-6)

    # --- case 2: without goal ---
    s_out2, o_out2 = module(slots, observations)
    jax.block_until_ready((s_out2, o_out2))
    assert jnp.allclose(s_out2, slots + pe[:, :slot_len], atol=1e-6)
    assert jnp.allclose(o_out2, observations + pe[:, slot_len:slot_len + obs_len], atol=1e-6)

    # --- case 3: B >= 16 (megacore split into >=2 steps + masked partial tile) ---
    Bb = 20
    kb1, kb2 = jax.random.split(k4)
    slots_b = jax.random.normal(kb1, (Bb, slot_len, D), dtype=jnp.float32)
    obs_b = jax.random.normal(kb2, (Bb, obs_len, D), dtype=jnp.float32)
    s_b, o_b = module(slots_b, obs_b)
    jax.block_until_ready((s_b, o_b))
    assert jnp.allclose(s_b, slots_b + pe[:, :slot_len], atol=1e-6)
    assert jnp.allclose(o_b, obs_b + pe[:, slot_len:slot_len + obs_len], atol=1e-6)

    # --- case 4: bf16 activations — add in f32, output cast back to bf16 ---
    slots_bf = slots.astype(jnp.bfloat16)
    obs_bf = observations.astype(jnp.bfloat16)
    s_bf, o_bf = module(slots_bf, obs_bf)
    jax.block_until_ready((s_bf, o_bf))
    assert s_bf.dtype == jnp.bfloat16 and o_bf.dtype == jnp.bfloat16
    s_bf_ref = (slots_bf.astype(jnp.float32) + pe[:, :slot_len]).astype(jnp.bfloat16)
    assert jnp.allclose(s_bf.astype(jnp.float32), s_bf_ref.astype(jnp.float32), atol=1e-2)

    # --- case 5: exercise the lane-tiled fallback path (forced tiny budget) ---
    slab, offs = module._pe_slab((slot_len,))
    x2d = slots.reshape(B, slot_len * D)
    pe2d = slab[:, offs[0]:offs[0] + slot_len * D]
    out2d = _lane_tiled_add_pe(x2d, pe2d, budget=1024, cap_limit=32 << 20)
    jax.block_until_ready(out2d)
    assert jnp.allclose(out2d.reshape(B, slot_len, D), slots + pe[:, :slot_len], atol=1e-6)

    print("KERNEL_OK")
</pallas_src>

<mosaic_0001>
module attributes {stable_mosaic.version = 11 : i64} {
  func.func @kernel(%arg0: i32, %arg1: memref<2x128xf32, #tpu.memory_space<vmem>>, %arg2: memref<2x256xf32, #tpu.memory_space<vmem>>, %arg3: memref<2x256xf32, #tpu.memory_space<vmem>>, %arg4: memref<1x640xf32, #tpu.memory_space<vmem>>, %arg5: memref<2x128xf32, #tpu.memory_space<vmem>>, %arg6: memref<2x256xf32, #tpu.memory_space<vmem>>, %arg7: memref<2x256xf32, #tpu.memory_space<vmem>>) attributes {dimension_semantics = [#tpu.dimension_semantics<parallel>], iteration_bounds = array<i64: 1>, scalar_prefetch = 0 : i64, scratch_operands = 0 : i64, tpu.core_type = #tpu.core_type<tc>, window_params = [{transform_indices = @transform_0, window_bounds = array<i64: 2, 128>}, {transform_indices = @transform_1, window_bounds = array<i64: 2, 256>}, {transform_indices = @transform_2, window_bounds = array<i64: 2, 256>}, {pipeline_mode = #tpu.pipeline_mode<synchronous>, transform_indices = @transform_3, window_bounds = array<i64: 1, 640>}, {transform_indices = @transform_4, window_bounds = array<i64: 2, 128>}, {transform_indices = @transform_5, window_bounds = array<i64: 2, 256>}, {transform_indices = @transform_6, window_bounds = array<i64: 2, 256>}]} {
    %c0 = arith.constant 0 : index
    %c0_0 = arith.constant 0 : index
    %0 = vector.load %arg4[%c0, %c0_0] : memref<1x640xf32, #tpu.memory_space<vmem>>, vector<1x128xf32>
    %c0_1 = arith.constant 0 : index
    %c0_2 = arith.constant 0 : index
    %1 = vector.load %arg1[%c0_1, %c0_2] : memref<2x128xf32, #tpu.memory_space<vmem>>, vector<2x128xf32>
    %2 = vector.broadcast %0 : vector<1x128xf32> to vector<2x128xf32>
    %3 = arith.addf %1, %2 : vector<2x128xf32>
    %c0_3 = arith.constant 0 : index
    %c0_4 = arith.constant 0 : index
    %4 = vector.load %arg5[%c0_3, %c0_4] : memref<2x128xf32, #tpu.memory_space<vmem>>, vector<2x128xf32>
    tpu.vector_store %arg5[%c0_3, %c0_4], %3 {strides = array<i32>} : memref<2x128xf32, #tpu.memory_space<vmem>>, vector<2x128xf32>,
    %c0_5 = arith.constant 0 : index
    %c128 = arith.constant 128 : index
    %5 = vector.load %arg4[%c0_5, %c128] : memref<1x640xf32, #tpu.memory_space<vmem>>, vector<1x256xf32>
    %c0_6 = arith.constant 0 : index
    %c0_7 = arith.constant 0 : index
    %6 = vector.load %arg2[%c0_6, %c0_7] : memref<2x256xf32, #tpu.memory_space<vmem>>, vector<2x256xf32>
    %7 = vector.broadcast %5 : vector<1x256xf32> to vector<2x256xf32>
    %8 = arith.addf %6, %7 : vector<2x256xf32>
    %c0_8 = arith.constant 0 : index
    %c0_9 = arith.constant 0 : index
    %9 = vector.load %arg6[%c0_8, %c0_9] : memref<2x256xf32, #tpu.memory_space<vmem>>, vector<2x256xf32>
    tpu.vector_store %arg6[%c0_8, %c0_9], %8 {strides = array<i32>} : memref<2x256xf32, #tpu.memory_space<vmem>>, vector<2x256xf32>,
    %c0_10 = arith.constant 0 : index
    %c384 = arith.constant 384 : index
    %10 = vector.load %arg4[%c0_10, %c384] : memref<1x640xf32, #tpu.memory_space<vmem>>, vector<1x256xf32>
    %c0_11 = arith.constant 0 : index
    %c0_12 = arith.constant 0 : index
    %11 = vector.load %arg3[%c0_11, %c0_12] : memref<2x256xf32, #tpu.memory_space<vmem>>, vector<2x256xf32>
    %12 = vector.broadcast %10 : vector<1x256xf32> to vector<2x256xf32>
    %13 = arith.addf %11, %12 : vector<2x256xf32>
    %c0_13 = arith.constant 0 : index
    %c0_14 = arith.constant 0 : index
    %14 = vector.load %arg7[%c0_13, %c0_14] : memref<2x256xf32, #tpu.memory_space<vmem>>, vector<2x256xf32>
    tpu.vector_store %arg7[%c0_13, %c0_14], %13 {strides = array<i32>} : memref<2x256xf32, #tpu.memory_space<vmem>>, vector<2x256xf32>,
    return
  }
  func.func @transform_0(%arg0: i32) -> (i32, i32) {
    %c0_i32 = arith.constant 0 : i32
    %c0_i32_0 = arith.constant 0 : i32
    return %arg0, %c0_i32 : i32, i32
  }
  func.func @transform_1(%arg0: i32) -> (i32, i32) {
    %c0_i32 = arith.constant 0 : i32
    %c0_i32_0 = arith.constant 0 : i32
    return %arg0, %c0_i32 : i32, i32
  }
  func.func @transform_2(%arg0: i32) -> (i32, i32) {
    %c0_i32 = arith.constant 0 : i32
    %c0_i32_0 = arith.constant 0 : i32
    return %arg0, %c0_i32 : i32, i32
  }
  func.func @transform_3(%arg0: i32) -> (i32, i32) {
    %c0_i32 = arith.constant 0 : i32
    %c0_i32_0 = arith.constant 0 : i32
    %c0_i32_1 = arith.constant 0 : i32
    return %c0_i32, %c0_i32_0 : i32, i32
  }
  func.func @transform_4(%arg0: i32) -> (i32, i32) {
    %c0_i32 = arith.constant 0 : i32
    %c0_i32_0 = arith.constant 0 : i32
    return %arg0, %c0_i32 : i32, i32
  }
  func.func @transform_5(%arg0: i32) -> (i32, i32) {
    %c0_i32 = arith.constant 0 : i32
    %c0_i32_0 = arith.constant 0 : i32
    return %arg0, %c0_i32 : i32, i32
  }
  func.func @transform_6(%arg0: i32) -> (i32, i32) {
    %c0_i32 = arith.constant 0 : i32
    %c0_i32_0 = arith.constant 0 : i32
    return %arg0, %c0_i32 : i32, i32
  }
}

</mosaic_0001>

<bundles_post_ra>
// kernel: tpu_custom_call.1
= control target key start
LH: loop header
LB: loop body
LE: loop exit
PB: predicated region body
PF: predicated region fallthrough
CT: control target
= control target key end

     0   :  { %12 = vsyncpa [#allocation3], 0  ;;  %s406_s0 = inlined_call_operand.hbm [shape: f32[2,128], index: 0, kind: input, shape index: {}]   ;;  %s407_s1 = inlined_call_operand.hbm [shape: f32[2,256], index: 1, kind: input, shape index: {}]   ;;  %s408_s2 = inlined_call_operand.hbm [shape: f32[2,256], index: 2, kind: input, shape index: {}]   ;;  %s409_s3 = inlined_call_operand.hbm [shape: f32[1,640], index: 3, kind: input, shape index: {}]   ;;  %s410_s4 = inlined_call_operand.hbm [shape: f32[2,128], index: 4, kind: output, shape index: {0}]   ;;  %s411_s5 = inlined_call_operand.hbm [shape: f32[2,256], index: 5, kind: output, shape index: {1}]   ;;  %s412_s6 = inlined_call_operand.hbm [shape: f32[2,256], index: 6, kind: output, shape index: {2}]  }
   0x1   :  { %13 = vsyncpa [#allocation6], 0 }
   0x2   :  { %14 = vsyncpa [#allocation9], 0 }
   0x3   :  { %15 = vsyncpa [#allocation4], 0  ;;  %s33_s23 = sshll.u32 %s407_s1, 4  ;;  %s34_s23 = int_to_ptr.hbm [resolvable:$true] %s33_s23 }
   0x4   :  { %16 = vsyncpa [#allocation12], 0  ;;  %s341_s24 = smov [#allocation5]   ;;  %s22_s28 = sshll.u32 %s406_s0, 4  ;;  %s23_s28 = int_to_ptr.hbm [resolvable:$true] %s22_s28 }
   0x5   :  { %s35_s25 = sshll.u32 %s341_s24, 4  ;;  %s342_s29 = smov [#allocation2]   ;;  %s36_s25 = int_to_ptr.vmem [resolvable:$true] %s35_s25 }
   0x6   :  { %38 = dma.hbm_to_vmem [thread:$0]  %s34_s23, 64, %s36_s25, [#allocation6]  }
   0x7   :  { %s24_s30 = sshll.u32 %s342_s29, 4  ;;  %s44_s9 = sshll.u32 %s408_s2, 4  ;;  %s25_s30 = int_to_ptr.vmem [resolvable:$true] %s24_s30  ;;  %s45_s9 = int_to_ptr.hbm [resolvable:$true] %s44_s9 }
   0x8   :  { %27 = dma.hbm_to_vmem [thread:$0]  %s23_s28, 32, %s25_s30, [#allocation3]  }
   0x9   :  { %s55_s11 = sshll.u32 %s409_s3, 4  ;;  %s343_s12 = smov [#allocation7]   ;;  %s56_s11 = int_to_ptr.hbm [resolvable:$true] %s55_s11 }
   0xa   :  { %s46_s13 = sshll.u32 %s343_s12, 4  ;;  %s344_s0 = smov [#allocation8]   ;;  %s47_s13 = int_to_ptr.vmem [resolvable:$true] %s46_s13 }
   0xb   :  { %49 = dma.hbm_to_vmem [thread:$0]  %s45_s9, 64, %s47_s13, [#allocation6]  }
   0xc   :  { %s57_s14 = sshll.u32 %s344_s0, 4  ;;  %s58_s14 = int_to_ptr.vmem [resolvable:$true] %s57_s14 }
   0xd   :  { %60 = dma.hbm_to_vmem [thread:$0]  %s56_s11, 80, %s58_s14, [#allocation9]  }
   0xe   :  { %331 = dma.done.wait [#allocation3], 32  }
   0xf   :  { %332 = vsyncadd [#allocation3], 4294967264 }
  0x10   :  { %333 = dma.done.wait [#allocation6], 128  }
  0x11   :  { %334 = vsyncadd [#allocation6], 4294967168 }
  0x12   :  { %335 = dma.done.wait [#allocation9], 80  }
  0x13   :  { %336 = vsyncadd [#allocation9], 4294967216  ;;  %s123_s16 = sshll.u32 %s411_s5, 4  ;;  %v84_v0 = vld [vmem:[#allocation8 + $0x1] sm:$0x3]  ;;  %s345_s3 = smov [#allocation10]   ;;  %s124_s16 = int_to_ptr.hbm [resolvable:$true] %s123_s16 }
  0x14   :  { %s110_s17 = sshll.u32 %s345_s3, 4  ;;  %s112_s20 = sshll.u32 %s410_s4, 4  ;;  %v87_v1 = vperm.slane %v84_v0, 0  ;;  %v88_v2 = vperm.slane %v84_v0, 1  ;;  %v78_v3 = vld [vmem:[#allocation2] sm:$0x3]  ;;  %s111_s17 = int_to_ptr.vmem [resolvable:$true] %s110_s17  ;;  %s113_s20 = int_to_ptr.hbm [resolvable:$true] %s112_s20 }
  0x15   :  { %v162_v4 = vld [vmem:[#allocation8] ss:$0 sm:$0xff]  ;;  %vm90_vm0 = vcmask 1041408   ;;  %v95_v5 = vld [vmem:[#allocation8 + $0x3] sm:$0x3]  ;;  %s346_s21 = smov [#allocation11]  }
  0x16   :  { %s121_s22 = sshll.u32 %s346_s21, 4  ;;  %v85_v6 = vld [vmem:[#allocation5] sm:$0xf]  ;;  %v89_v7 = vrot.slane %v88_v2, 6  ;;  %v82_v8 = vadd.f32 %v162_v4, %v78_v3  ;;  %v98_v9 = vperm.slane %v95_v5, 0  ;;  %v99_v10 = vperm.slane %v95_v5, 1  ;;  %s122_s22 = int_to_ptr.vmem [resolvable:$true] %s121_s22 }
  0x17   :  { %s134_s4 = sshll.u32 %s412_s6, 4  ;;  %v96_v12 = vld [vmem:[#allocation7] sm:$0xf]  ;;  %s347_s24 = smov [#allocation13]   ;;  %s135_s4 = int_to_ptr.hbm [resolvable:$true] %s134_s4 }
  0x18   :  { %v91_v11 = vsel %vm90_vm0, %v87_v1, %v89_v7  ;;  %83 = vst [vmem:[#allocation10] sm:$0x3] %v82_v8  ;;  %v100_v13 = vrot.slane %v99_v10, 6  ;;  %s132_s25 = sshll.u32 %s347_s24, 4  ;;  %s133_s25 = int_to_ptr.vmem [resolvable:$true] %s132_s25 }
  0x19   :  { %v93_v14 = vadd.f32 %v91_v11, %v85_v6  ;;  %115 = dma.vmem_to_hbm [thread:$0]  %s111_s17, 32, %s113_s20, [#allocation4]  }
  0x1a   :  { %v101_v15 = vsel %vm90_vm0, %v98_v9, %v100_v13 }
  0x1b   :  { %94 = vst [vmem:[#allocation11] sm:$0xf] %v93_v14  ;;  %v103_v16 = vadd.f32 %v101_v15, %v96_v12 }
  0x1c   :  { %126 = dma.vmem_to_hbm [thread:$0]  %s122_s22, 64, %s124_s16, [#allocation12]  }
  0x1d   :  { %104 = vst [vmem:[#allocation13] sm:$0xf] %v103_v16 }
  0x1e   :  { %137 = dma.vmem_to_hbm [thread:$0]  %s133_s25, 64, %s135_s4, [#allocation12]  }
  0x1f   :  { %337 = dma.done.wait [#allocation4], 32  }
  0x20   :  { %338 = vsyncadd [#allocation4], 4294967264 }
  0x21   :  { %339 = dma.done.wait [#allocation12], 128  }
  0x22   :  { %340 = vsyncadd [#allocation12], 4294967168 }
  0x23   :  { %150 = vsyncpa [#allocation3], 1 }
  0x24   :  { %151 = vsyncpa [#allocation6], 1 }
  0x25   :  { %152 = vsyncpa [#allocation9], 1 }
  0x26   :  { %153 = vsyncpa [#allocation4], 1 }
  0x27   :  { %154 = vsyncpa [#allocation12], 1 }

</bundles_post_ra>
